<compile_context>
chip_gen: v6e
topology: v6e:2x2x1
jax: 0.10.0
libtpu: 0.0.40
codegen_flags: <defaults>
</compile_context>

<pallas_src>
import jax
import jax.numpy as jnp
from jax.experimental import pallas as pl
from jax.experimental.pallas import tpu as pltpu


_LANE = 128     # last-dim tiles must be multiples of 128
_SUBLANE = 8    # second-minor tiles must be multiples of 8


def _round_up(n, m):
    return ((n + m - 1) // m) * m


def _act(x):
    # The activation `f` handed to Generator.__init__ (tanh here).
    return jnp.tanh(x)


def generator_kernel(x_ref, w1_ref, b1_ref, w2_ref, b2_ref, w3_ref, b3_ref,
                     o_ref):
    """One batch-tile of the fused 3-layer MLP.  Matmul inputs are bf16,
    accumulation / bias / tanh are f32."""
    x = x_ref[...]                                             # (TB, IN_P) bf16

    # layer 1: Linear + f
    h = jnp.dot(x, w1_ref[...], preferred_element_type=jnp.float32)
    h = _act(h + b1_ref[...])

    # layer 2: Linear + f
    h = jnp.dot(h.astype(w2_ref.dtype), w2_ref[...],
                preferred_element_type=jnp.float32)
    h = _act(h + b2_ref[...])

    # layer 3: Linear (no activation, matches forward())
    out = jnp.dot(h.astype(w3_ref.dtype), w3_ref[...],
                  preferred_element_type=jnp.float32)
    o_ref[...] = (out + b3_ref[...]).astype(o_ref.dtype)


def generator_forward(x, params, *, tb=256, matmul_dtype=jnp.bfloat16):
    """params = (w1, b1, w2, b2, w3, b3); weights (in, out), biases (1, out)."""
    w1, b1, w2, b2, w3, b3 = params
    batch, in_f = x.shape
    hid_f = w1.shape[1]
    out_f = w3.shape[1]

    # Lane-dense / MXU-friendly padded feature sizes.
    in_p = _round_up(in_f, _LANE)
    hid_p = _round_up(hid_f, _LANE)
    out_p = _round_up(out_f, _LANE)

    # Batch tile: multiple of 8, no larger than needed; pad batch to a
    # whole number of tiles.
    tb = min(tb, _round_up(batch, _SUBLANE))
    batch_p = _round_up(batch, tb)

    def pad2(a, rows, cols, dtype):
        a = a.astype(dtype)
        return jnp.pad(a, ((0, rows - a.shape[0]), (0, cols - a.shape[1])))

    xp = pad2(x, batch_p, in_p, matmul_dtype)
    w1p = pad2(w1, in_p, hid_p, matmul_dtype)
    w2p = pad2(w2, hid_p, hid_p, matmul_dtype)
    w3p = pad2(w3, hid_p, out_p, matmul_dtype)
    b1p = pad2(b1, 1, hid_p, jnp.float32)
    b2p = pad2(b2, 1, hid_p, jnp.float32)
    b3p = pad2(b3, 1, out_p, jnp.float32)

    grid = (batch_p // tb,)

    def resident(shape):
        # Same block index every grid step -> stays resident in VMEM.
        return pl.BlockSpec(shape, lambda i: (0, 0))

    out_padded = pl.pallas_call(
        generator_kernel,
        out_shape=jax.ShapeDtypeStruct((batch_p, out_p), jnp.float32),
        grid=grid,
        in_specs=[
            pl.BlockSpec((tb, in_p), lambda i: (i, 0)),   # x: tiled over batch
            resident((in_p, hid_p)),                      # w1
            resident((1, hid_p)),                         # b1
            resident((hid_p, hid_p)),                     # w2
            resident((1, hid_p)),                         # b2
            resident((hid_p, out_p)),                     # w3
            resident((1, out_p)),                         # b3
        ],
        out_specs=pl.BlockSpec((tb, out_p), lambda i: (i, 0)),
        compiler_params=pltpu.CompilerParams(
            dimension_semantics=("parallel",)),
    )(xp, w1p, b1p, w2p, b2p, w3p, b3p)

    # Strip batch / feature padding.
    return out_padded[:batch, :out_f]


def init_params(key, input_size, hidden_size, output_size):
    """Deterministic synthetic init (PyTorch-style uniform(-1/sqrt(fan_in)))."""
    ks = jax.random.split(key, 6)

    def lin(kw, kb, fan_in, fan_out):
        bound = 1.0 / jnp.sqrt(jnp.float32(fan_in))
        w = jax.random.uniform(kw, (fan_in, fan_out), jnp.float32,
                               minval=-bound, maxval=bound)
        b = jax.random.uniform(kb, (1, fan_out), jnp.float32,
                               minval=-bound, maxval=bound)
        return w, b

    w1, b1 = lin(ks[0], ks[1], input_size, hidden_size)
    w2, b2 = lin(ks[2], ks[3], hidden_size, hidden_size)
    w3, b3 = lin(ks[4], ks[5], hidden_size, output_size)
    return (w1, b1, w2, b2, w3, b3)


def reference_forward(x, params, matmul_dtype=jnp.float32):
    """Plain-JAX reference matching the PyTorch forward (optionally with the
    same bf16 matmul-input cast the kernel uses)."""
    w1, b1, w2, b2, w3, b3 = params

    def mm(a, w):
        return jnp.dot(a.astype(matmul_dtype), w.astype(matmul_dtype),
                       preferred_element_type=jnp.float32)

    h = _act(mm(x, w1) + b1)
    h = _act(mm(h, w2) + b2)
    return mm(h, w3) + b3


if __name__ == "__main__":
    # Small shapes consistent with the 1-D Gaussian GAN generator.
    batch, input_size, hidden_size, output_size = 8, 4, 32, 4

    key = jax.random.PRNGKey(0)
    k_x, k_p = jax.random.split(key)

    x = jax.random.normal(k_x, (batch, input_size), jnp.float32)
    params = init_params(k_p, input_size, hidden_size, output_size)

    out = generator_forward(x, params)
    out = jax.block_until_ready(out)

    ref_f32 = reference_forward(x, params)                          # exact f32
    ref_bf16 = reference_forward(x, params, matmul_dtype=jnp.bfloat16)

    assert out.shape == (batch, output_size)
    # Matched-precision check (same bf16 matmul inputs, f32 accumulation).
    assert jnp.allclose(out, ref_bf16, atol=1e-2, rtol=1e-2)
    # Check vs the full-f32 PyTorch-equivalent forward (bf16 inputs lose ~3
    # decimal digits, hence the looser tolerance than the pure-f32 version).
    assert jnp.allclose(out, ref_f32, atol=2e-2, rtol=2e-2)

    print("KERNEL_OK")
</pallas_src>

<mosaic_0001>
module attributes {stable_mosaic.version = 11 : i64} {
  func.func @generator_kernel(%arg0: i32, %arg1: memref<8x128xbf16, #tpu.memory_space<vmem>>, %arg2: memref<128x128xbf16, #tpu.memory_space<vmem>>, %arg3: memref<1x128xf32, #tpu.memory_space<vmem>>, %arg4: memref<128x128xbf16, #tpu.memory_space<vmem>>, %arg5: memref<1x128xf32, #tpu.memory_space<vmem>>, %arg6: memref<128x128xbf16, #tpu.memory_space<vmem>>, %arg7: memref<1x128xf32, #tpu.memory_space<vmem>>, %arg8: memref<8x128xf32, #tpu.memory_space<vmem>>) attributes {dimension_semantics = [#tpu.dimension_semantics<parallel>], iteration_bounds = array<i64: 1>, scalar_prefetch = 0 : i64, scratch_operands = 0 : i64, tpu.core_type = #tpu.core_type<tc>, window_params = [{transform_indices = @transform_0, window_bounds = array<i64: 8, 128>}, {pipeline_mode = #tpu.pipeline_mode<synchronous>, transform_indices = @transform_1, window_bounds = array<i64: 128, 128>}, {pipeline_mode = #tpu.pipeline_mode<synchronous>, transform_indices = @transform_2, window_bounds = array<i64: 1, 128>}, {pipeline_mode = #tpu.pipeline_mode<synchronous>, transform_indices = @transform_3, window_bounds = array<i64: 128, 128>}, {pipeline_mode = #tpu.pipeline_mode<synchronous>, transform_indices = @transform_4, window_bounds = array<i64: 1, 128>}, {pipeline_mode = #tpu.pipeline_mode<synchronous>, transform_indices = @transform_5, window_bounds = array<i64: 128, 128>}, {pipeline_mode = #tpu.pipeline_mode<synchronous>, transform_indices = @transform_6, window_bounds = array<i64: 1, 128>}, {transform_indices = @transform_7, window_bounds = array<i64: 8, 128>}]} {
    %c0 = arith.constant 0 : index
    %c0_0 = arith.constant 0 : index
    %0 = vector.load %arg1[%c0, %c0_0] : memref<8x128xbf16, #tpu.memory_space<vmem>>, vector<8x128xbf16>
    %c0_1 = arith.constant 0 : index
    %c0_2 = arith.constant 0 : index
    %1 = vector.load %arg2[%c0_1, %c0_2] : memref<128x128xbf16, #tpu.memory_space<vmem>>, vector<128x128xbf16>
    %cst = arith.constant dense<0.000000e+00> : vector<8x128xf32>
    %2 = tpu.matmul %0, %1, %cst {dimension_numbers = #tpu.dot_dimension_numbers<[1], [0], [0], [1], [0, 0, 1, 1], [], []>} : vector<8x128xbf16>, vector<128x128xbf16>, vector<8x128xf32> -> vector<8x128xf32>
    %c0_3 = arith.constant 0 : index
    %c0_4 = arith.constant 0 : index
    %3 = vector.load %arg3[%c0_3, %c0_4] : memref<1x128xf32, #tpu.memory_space<vmem>>, vector<1x128xf32>
    %4 = vector.broadcast %3 : vector<1x128xf32> to vector<8x128xf32>
    %5 = arith.addf %2, %4 : vector<8x128xf32>
    %6 = math.tanh %5 : vector<8x128xf32>
    %7 = arith.truncf %6 : vector<8x128xf32> to vector<8x128xbf16>
    %c0_5 = arith.constant 0 : index
    %c0_6 = arith.constant 0 : index
    %8 = vector.load %arg4[%c0_5, %c0_6] : memref<128x128xbf16, #tpu.memory_space<vmem>>, vector<128x128xbf16>
    %cst_7 = arith.constant dense<0.000000e+00> : vector<8x128xf32>
    %9 = tpu.matmul %7, %8, %cst_7 {dimension_numbers = #tpu.dot_dimension_numbers<[1], [0], [0], [1], [0, 0, 1, 1], [], []>} : vector<8x128xbf16>, vector<128x128xbf16>, vector<8x128xf32> -> vector<8x128xf32>
    %c0_8 = arith.constant 0 : index
    %c0_9 = arith.constant 0 : index
    %10 = vector.load %arg5[%c0_8, %c0_9] : memref<1x128xf32, #tpu.memory_space<vmem>>, vector<1x128xf32>
    %11 = vector.broadcast %10 : vector<1x128xf32> to vector<8x128xf32>
    %12 = arith.addf %9, %11 : vector<8x128xf32>
    %13 = math.tanh %12 : vector<8x128xf32>
    %14 = arith.truncf %13 : vector<8x128xf32> to vector<8x128xbf16>
    %c0_10 = arith.constant 0 : index
    %c0_11 = arith.constant 0 : index
    %15 = vector.load %arg6[%c0_10, %c0_11] : memref<128x128xbf16, #tpu.memory_space<vmem>>, vector<128x128xbf16>
    %cst_12 = arith.constant dense<0.000000e+00> : vector<8x128xf32>
    %16 = tpu.matmul %14, %15, %cst_12 {dimension_numbers = #tpu.dot_dimension_numbers<[1], [0], [0], [1], [0, 0, 1, 1], [], []>} : vector<8x128xbf16>, vector<128x128xbf16>, vector<8x128xf32> -> vector<8x128xf32>
    %c0_13 = arith.constant 0 : index
    %c0_14 = arith.constant 0 : index
    %17 = vector.load %arg7[%c0_13, %c0_14] : memref<1x128xf32, #tpu.memory_space<vmem>>, vector<1x128xf32>
    %18 = vector.broadcast %17 : vector<1x128xf32> to vector<8x128xf32>
    %19 = arith.addf %16, %18 : vector<8x128xf32>
    %c0_15 = arith.constant 0 : index
    %c0_16 = arith.constant 0 : index
    %20 = vector.load %arg8[%c0_15, %c0_16] : memref<8x128xf32, #tpu.memory_space<vmem>>, vector<8x128xf32>
    tpu.vector_store %arg8[%c0_15, %c0_16], %19 {strides = array<i32>} : memref<8x128xf32, #tpu.memory_space<vmem>>, vector<8x128xf32>,
    return
  }
  func.func @transform_0(%arg0: i32) -> (i32, i32) {
    %c0_i32 = arith.constant 0 : i32
    %c0_i32_0 = arith.constant 0 : i32
    return %arg0, %c0_i32 : i32, i32
  }
  func.func @transform_1(%arg0: i32) -> (i32, i32) {
    %c0_i32 = arith.constant 0 : i32
    %c0_i32_0 = arith.constant 0 : i32
    %c0_i32_1 = arith.constant 0 : i32
    return %c0_i32, %c0_i32_0 : i32, i32
  }
  func.func @transform_2(%arg0: i32) -> (i32, i32) {
    %c0_i32 = arith.constant 0 : i32
    %c0_i32_0 = arith.constant 0 : i32
    %c0_i32_1 = arith.constant 0 : i32
    return %c0_i32, %c0_i32_0 : i32, i32
  }
  func.func @transform_3(%arg0: i32) -> (i32, i32) {
    %c0_i32 = arith.constant 0 : i32
    %c0_i32_0 = arith.constant 0 : i32
    %c0_i32_1 = arith.constant 0 : i32
    return %c0_i32, %c0_i32_0 : i32, i32
  }
  func.func @transform_4(%arg0: i32) -> (i32, i32) {
    %c0_i32 = arith.constant 0 : i32
    %c0_i32_0 = arith.constant 0 : i32
    %c0_i32_1 = arith.constant 0 : i32
    return %c0_i32, %c0_i32_0 : i32, i32
  }
  func.func @transform_5(%arg0: i32) -> (i32, i32) {
    %c0_i32 = arith.constant 0 : i32
    %c0_i32_0 = arith.constant 0 : i32
    %c0_i32_1 = arith.constant 0 : i32
    return %c0_i32, %c0_i32_0 : i32, i32
  }
  func.func @transform_6(%arg0: i32) -> (i32, i32) {
    %c0_i32 = arith.constant 0 : i32
    %c0_i32_0 = arith.constant 0 : i32
    %c0_i32_1 = arith.constant 0 : i32
    return %c0_i32, %c0_i32_0 : i32, i32
  }
  func.func @transform_7(%arg0: i32) -> (i32, i32) {
    %c0_i32 = arith.constant 0 : i32
    %c0_i32_0 = arith.constant 0 : i32
    return %arg0, %c0_i32 : i32, i32
  }
}

</mosaic_0001>

<bundles_post_ra>
// kernel: tpu_custom_call.1
= control target key start
LH: loop header
LB: loop body
LE: loop exit
PB: predicated region body
PF: predicated region fallthrough
CT: control target
= control target key end

     0   :  { %12 = vsyncpa [#allocation3], 0  ;;  %s808_s0 = inlined_call_operand.hbm [shape: bf16[8,128], index: 0, kind: input, shape index: {}]   ;;  %s809_s1 = inlined_call_operand.hbm [shape: bf16[128,128], index: 1, kind: input, shape index: {}]   ;;  %s810_s2 = inlined_call_operand.vmem [shape: f32[1,128], index: 2, kind: input, shape index: {}]   ;;  %s811_s3 = inlined_call_operand.hbm [shape: bf16[128,128], index: 3, kind: input, shape index: {}]   ;;  %s812_s4 = inlined_call_operand.vmem [shape: f32[1,128], index: 4, kind: input, shape index: {}]   ;;  %s813_s5 = inlined_call_operand.hbm [shape: bf16[128,128], index: 5, kind: input, shape index: {}]   ;;  %s814_s6 = inlined_call_operand.vmem [shape: f32[1,128], index: 6, kind: input, shape index: {}]   ;;  %s815_s7 = inlined_call_operand.hbm [shape: f32[8,128], index: 7, kind: output, shape index: {}]  }
   0x1   :  { %13 = vsyncpa [#allocation6], 0 }
   0x2   :  { %14 = vsyncpa [#allocation9], 0 }
   0x3   :  { %15 = vsyncpa [#allocation4], 0  ;;  %s696_s24 = smov [#allocation5]  }
   0x4   :  { %s31_s25 = sshll.u32 %s696_s24, 4  ;;  %s32_s25 = int_to_ptr.vmem [resolvable:$true] %s31_s25 }
   0x5   :  { %s596_s26 = scalar_lea.vmem %s32_s25, 1024  ;;  %p601_p1 = scmp.lt.s32.totalorder %s32_s25, %s32_s25 }
   0x6   :  { %p597_p0 = scmp.ne.s32.totalorder %s32_s25, %s596_s26  ;;  %p602_p2 = scmp.lt.s32.totalorder %s596_s26, %s596_s26 }
   0x8   :  { %p603_p3 = por %p602_p2, %p601_p1 }
   0xa   :  { %p604_p4 = pnand %p603_p3, %p597_p0 }
   0xc   :  { %607 = shalt.err (!%p604_p4)
}
   0xd   :  { %s697_s27 = smov 64   ;;  %s698_s28 = smov 4  }
   0xe   :  { %37 = dma.hbm_to_vmem [thread:$0]  %s809_s1, 1024, %s32_s25, [#allocation6], %s697_s27, %s697_s27, %s698_s28  }
   0xf   :  { %s699_s8 = smov [#allocation2]   ;;  %s700_s10 = smov [#allocation7]  }
  0x10   :  { %s22_s9 = sshll.u32 %s699_s8, 4  ;;  %s45_s11 = sshll.u32 %s700_s10, 4  ;;  %s23_s9 = int_to_ptr.vmem [resolvable:$true] %s22_s9  ;;  %s46_s11 = int_to_ptr.vmem [resolvable:$true] %s45_s11 }
  0x11   :  { %s616_s12 = scalar_lea.vmem %s23_s9, 64  ;;  %p621_p6 = scmp.lt.s32.totalorder %s23_s9, %s23_s9 }
  0x12   :  { %p617_p5 = scmp.ne.s32.totalorder %s23_s9, %s616_s12  ;;  %p622_p7 = scmp.lt.s32.totalorder %s616_s12, %s616_s12 }
  0x14   :  { %p623_p8 = por %p622_p7, %p621_p6 }
  0x16   :  { %p624_p9 = pnand %p623_p8, %p617_p5 }
  0x18   :  { %627 = shalt.err (!%p624_p9)
}
  0x19   :  { %25 = dma.hbm_to_vmem [thread:$0]  %s808_s0, 64, %s23_s9, [#allocation3]  }
  0x1a   :  { %s636_s15 = scalar_lea.vmem %s46_s11, 1024  ;;  %p641_p11 = scmp.lt.s32.totalorder %s46_s11, %s46_s11 }
  0x1b   :  { %p637_p10 = scmp.ne.s32.totalorder %s46_s11, %s636_s15  ;;  %p642_p12 = scmp.lt.s32.totalorder %s636_s15, %s636_s15 }
  0x1d   :  { %p643_p13 = por %p642_p12, %p641_p11 }
  0x1f   :  { %p644_p0 = pnand %p643_p13, %p637_p10 }
  0x21   :  { %647 = shalt.err (!%p644_p0)
}
  0x22   :  { %51 = dma.hbm_to_vmem [thread:$0]  %s811_s3, 1024, %s46_s11, [#allocation6], %s697_s27, %s697_s27, %s698_s28  }
  0x23   :  { %s701_s17 = smov [#allocation8]  }
  0x24   :  { %s59_s18 = sshll.u32 %s701_s17, 4  ;;  %s60_s18 = int_to_ptr.vmem [resolvable:$true] %s59_s18 }
  0x25   :  { %s656_s19 = scalar_lea.vmem %s60_s18, 1024  ;;  %p661_p2 = scmp.lt.s32.totalorder %s60_s18, %s60_s18 }
  0x26   :  { %p657_p1 = scmp.ne.s32.totalorder %s60_s18, %s656_s19  ;;  %p662_p3 = scmp.lt.s32.totalorder %s656_s19, %s656_s19 }
  0x28   :  { %p663_p4 = por %p662_p3, %p661_p2 }
  0x2a   :  { %p664_p5 = pnand %p663_p4, %p657_p1 }
  0x2c   :  { %667 = shalt.err (!%p664_p5)
}
  0x2d   :  { %65 = dma.hbm_to_vmem [thread:$0]  %s813_s5, 1024, %s60_s18, [#allocation9], %s697_s27, %s697_s27, %s698_s28  }
  0x2e   :  { %688 = dma.done.wait [#allocation3], 64  }
  0x2f   :  { %689 = vsyncadd [#allocation3], 4294967232 }
  0x30   :  { %690 = dma.done.wait [#allocation6], 2048  }
  0x31   :  { %691 = vsyncadd [#allocation6], 4294965248 }
  0x32   :  { %692 = dma.done.wait [#allocation9], 1024  }
  0x33   :  { %693 = vsyncadd [#allocation9], 4294966272  ;;  %v702_v0 = vmov 0.0   ;;  %vm703_vm0 = vmmov 0   ;;  %v560_v1 = vld [vmem:[#allocation5 + $0x38] sm:$0xff]   ;;  %v561_v2 = vld [vmem:[#allocation5 + $0x30] sm:$0xff]  }
  0x34   :  { %491 = vmatprep.subr.bf16.mxu0 %v702_v0  ;;  %507 = vmatprep.mubr.msk.bf16.mxu0 %vm703_vm0, %v702_v0  ;;  %v562_v3 = vld [vmem:[#allocation5 + $0x28] sm:$0xff]   ;;  %v568_v4 = vld [vmem:[#allocation7 + $0x38] sm:$0xff]   ;;  %v563_v5 = vld [vmem:[#allocation5 + $0x20] sm:$0xff]   ;;  %s704_s24 = smov [#allocation10]  }
  0x35   :  { %511 = vmatprep.subr.bf16.mxu1 %v702_v0  ;;  %527 = vmatprep.mubr.msk.bf16.mxu1 %vm703_vm0, %v702_v0  ;;  %v569_v6 = vld [vmem:[#allocation7 + $0x30] sm:$0xff]   ;;  %v564_v7 = vld [vmem:[#allocation5 + $0x18] sm:$0xff]   ;;  %v570_v8 = vld [vmem:[#allocation7 + $0x28] sm:$0xff]   ;;  %s426_s25 = sshll.u32 %s704_s24, 4  ;;  %s427_s25 = int_to_ptr.vmem [resolvable:$true] %s426_s25 }
  0x36   :  { %492 = vmatpush3.bf16.msra.mxu0 %v560_v1  ;;  %512 = vmatpush3.bf16.msra.mxu1 %v568_v4  ;;  %v565_v9 = vld [vmem:[#allocation5 + $0x10] sm:$0xff]   ;;  %v566_v10 = vld [vmem:[#allocation5 + $0x8] sm:$0xff]   ;;  %v567_v11 = vld [vmem:[#allocation5] sm:$0xff]   ;;  %p673_p7 = scmp.lt.s32.totalorder %s427_s25, %s427_s25 }
  0x37   :  { %493 = vmatprep.subr.bf16.mxu0 %v702_v0  ;;  %513 = vmatprep.subr.bf16.mxu1 %v702_v0  ;;  %v81_v12 = vld [vmem:[#allocation2] sm:$0xf]  ;;  %v571_v13 = vld [vmem:[#allocation7 + $0x20] sm:$0xff]   ;;  %v573_v15 = vld [vmem:[#allocation7 + $0x10] sm:$0xff]  }
  0x38   :  { %v572_v14 = vld [vmem:[#allocation7 + $0x18] sm:$0xff]   ;;  %v574_v16 = vld [vmem:[#allocation7 + $0x8] sm:$0xff]   ;;  %v575_v17 = vld [vmem:[#allocation7] sm:$0xff]  }
  0x39   :  { %v576_v18 = vld [vmem:[#allocation8 + $0x38] sm:$0xff]   ;;  %v577_v19 = vld [vmem:[#allocation8 + $0x30] sm:$0xff]   ;;  %v578_v20 = vld [vmem:[#allocation8 + $0x28] sm:$0xff]  }
  0x3a   :  { %494 = vmatpush3.bf16.msra.mxu0 %v561_v2  ;;  %514 = vmatpush3.bf16.msra.mxu1 %v569_v6  ;;  %v437_v21 = vld [vmem:[%s810_s2] ss:$0 sm:$0xff]  ;;  %v579_v29 = vld [vmem:[#allocation8 + $0x20] sm:$0xff]   ;;  %v581_v31 = vld [vmem:[#allocation8 + $0x10] sm:$0xff]  }
  0x3b   :  { %495 = vmatprep.subr.bf16.mxu0 %v702_v0  ;;  %515 = vmatprep.subr.bf16.mxu1 %v702_v0  ;;  %v580_v30 = vld [vmem:[#allocation8 + $0x18] sm:$0xff]   ;;  %v582_v32 = vld [vmem:[#allocation8 + $0x8] sm:$0xff]   ;;  %v583_v33 = vld [vmem:[#allocation8] sm:$0xff]  }
  0x3c   :  { %v446_v34 = vld [vmem:[%s812_s4] ss:$0 sm:$0xff]  ;;  %s668_s4 = scalar_lea.vmem %s427_s25, 128 }
  0x3d   :  { %v455_v42 = vld [vmem:[%s814_s6] ss:$0 sm:$0xff]  ;;  %p669_p6 = scmp.ne.s32.totalorder %s427_s25, %s668_s4  ;;  %p674_p8 = scmp.lt.s32.totalorder %s668_s4, %s668_s4 }
  0x3e   :  { %496 = vmatpush3.bf16.msra.mxu0 %v562_v3  ;;  %516 = vmatpush3.bf16.msra.mxu1 %v570_v8 }
  0x3f   :  { %497 = vmatprep.subr.bf16.mxu0 %v702_v0  ;;  %517 = vmatprep.subr.bf16.mxu1 %v702_v0  ;;  %p675_p9 = por %p674_p8, %p673_p7 }
  0x41   :  { %p676_p10 = pnand %p675_p9, %p669_p6 }
  0x42   :  { %498 = vmatpush3.bf16.msra.mxu0 %v563_v5  ;;  %518 = vmatpush3.bf16.msra.mxu1 %v571_v13 }
  0x43   :  { %499 = vmatprep.subr.bf16.mxu0 %v702_v0  ;;  %519 = vmatprep.subr.bf16.mxu1 %v702_v0 }
  0x46   :  { %500 = vmatpush3.bf16.msra.mxu0 %v564_v7  ;;  %520 = vmatpush3.bf16.msra.mxu1 %v572_v14 }
  0x47   :  { %501 = vmatprep.subr.bf16.mxu0 %v702_v0  ;;  %521 = vmatprep.subr.bf16.mxu1 %v702_v0 }
  0x4a   :  { %502 = vmatpush3.bf16.msra.mxu0 %v565_v9  ;;  %522 = vmatpush3.bf16.msra.mxu1 %v573_v15 }
  0x4b   :  { %503 = vmatprep.subr.bf16.mxu0 %v702_v0  ;;  %523 = vmatprep.subr.bf16.mxu1 %v702_v0 }
  0x4e   :  { %504 = vmatpush3.bf16.msra.mxu0 %v566_v10  ;;  %524 = vmatpush3.bf16.msra.mxu1 %v574_v16 }
  0x4f   :  { %505 = vmatprep.subr.bf16.mxu0 %v702_v0  ;;  %525 = vmatprep.subr.bf16.mxu1 %v702_v0 }
  0x52   :  { %506 = vmatpush3.bf16.msra.mxu0 %v567_v11  ;;  %526 = vmatpush3.bf16.msra.mxu1 %v575_v17 }
  0x53   :  { %531 = vmatprep.subr.bf16.mxu0 %v702_v0 }
  0x55   :  { %508 = vmatmul.mubr.bf16.vlgmr.msra.gmra.mxu0 %v81_v12 }
  0x56   :  { %547 = vmatprep.mubr.msk.bf16.mxu0 %vm703_vm0, %v702_v0  ;;  %532 = vmatpush3.bf16.msra.mxu0 %v576_v18 }
  0x57   :  { %533 = vmatprep.subr.bf16.mxu0 %v702_v0 }
  0x5a   :  { %534 = vmatpush3.bf16.msra.mxu0 %v577_v19 }
  0x5b   :  { %535 = vmatprep.subr.bf16.mxu0 %v702_v0 }
  0x5e   :  { %536 = vmatpush3.bf16.msra.mxu0 %v578_v20 }
  0x5f   :  { %537 = vmatprep.subr.bf16.mxu0 %v702_v0 }
  0x62   :  { %538 = vmatpush3.bf16.msra.mxu0 %v579_v29 }
  0x63   :  { %539 = vmatprep.subr.bf16.mxu0 %v702_v0 }
  0x66   :  { %540 = vmatpush3.bf16.msra.mxu0 %v580_v30 }
  0x67   :  { %541 = vmatprep.subr.bf16.mxu0 %v702_v0 }
  0x6a   :  { %542 = vmatpush3.bf16.msra.mxu0 %v581_v31 }
  0x6b   :  { %543 = vmatprep.subr.bf16.mxu0 %v702_v0 }
  0x6e   :  { %544 = vmatpush3.bf16.msra.mxu0 %v582_v32 }
  0x6f   :  { %545 = vmatprep.subr.bf16.mxu0 %v702_v0 }
  0x72   :  { %546 = vmatpush3.bf16.msra.mxu0 %v583_v33 }
 0x115   :  { %v187_v22 = vpop.f32.mrf.mxu0 }
 0x116   :  { %v188_v23 = vadd.f32 %v437_v21, %v187_v22 }
 0x117   :  { %v509_v24 = vpop.f32.mrf.mxu0 }
 0x118   :  { %584 = vtanh.f32 %v188_v23 }
 0x119   :  { %v190_v25 = vpop.f32.mrf.mxu0 }
 0x11b   :  { %v510_v26 = vpop.f32.mrf.mxu0 }
 0x125   :  { %v585_v27 = vpop.eup %584 }
 0x126   :  { %v194_v28 = vpack.c.bf16 %v585_v27, %v585_v27 }
 0x128   :  { %528 = vmatmul.mubr.bf16.vlgmr.msra.gmra.mxu1 %v194_v28 }
 0x1e8   :  { %v300_v35 = vpop.f32.mrf.mxu1 }
 0x1e9   :  { %v301_v36 = vadd.f32 %v446_v34, %v300_v35 }
 0x1ea   :  { %v529_v37 = vpop.f32.mrf.mxu1 }
 0x1eb   :  { %586 = vtanh.f32 %v301_v36 }
 0x1ec   :  { %v303_v38 = vpop.f32.mrf.mxu1 }
 0x1ee   :  { %v530_v39 = vpop.f32.mrf.mxu1 }
 0x1f8   :  { %v587_v40 = vpop.eup %586 }
 0x1f9   :  { %v307_v41 = vpack.c.bf16 %v587_v40, %v587_v40 }
 0x1fb   :  { %548 = vmatmul.mubr.bf16.vlgmr.msra.gmra.mxu0 %v307_v41 }
 0x2bb   :  { %v413_v43 = vpop.f32.mrf.mxu0 }
 0x2bc   :  { %v414_v44 = vadd.f32 %v455_v42, %v413_v43 }
 0x2bd   :  { %v549_v45 = vpop.f32.mrf.mxu0 }
 0x2be   :  { %419 = vst [vmem:[#allocation10] sm:$0xff] %v414_v44 }
 0x2bf   :  { %v416_v46 = vpop.f32.mrf.mxu0 }
 0x2c0   :  { %679 = shalt.err (!%p676_p10)
}
 0x2c1   :  { %429 = dma.vmem_to_hbm [thread:$0]  %s427_s25, 128, %s815_s7, [#allocation4]   ;;  %v550_v47 = vpop.f32.mrf.mxu0 }
 0x2c2   :  { %694 = dma.done.wait [#allocation4], 128  }
 0x2c3   :  { %695 = vsyncadd [#allocation4], 4294967168 }
 0x2c4   :  { %433 = vsyncpa [#allocation3], 1 }
 0x2c5   :  { %434 = vsyncpa [#allocation6], 1 }
 0x2c6   :  { %435 = vsyncpa [#allocation9], 1 }
 0x2c7   :  { %436 = vsyncpa [#allocation4], 1 }

</bundles_post_ra>
